<compile_context>
chip_gen: v7x
topology: tpu7x:2x2x1
jax: 0.10.0
libtpu: 0.0.40
codegen_flags: <defaults>
</compile_context>

<pallas_src>
import numpy as np
import jax
import jax.numpy as jnp
from jax.experimental import pallas as pl
from jax.experimental.pallas import tpu as pltpu


def _round_up(x, m):
    return (x + m - 1) // m * m


# ------------------------------ Pallas kernel --------------------------------

def _make_kernel(wpp, m1, m2, res_off):
    """Fused conv1+bn1+relu+conv2+bn2+identity+relu for one (image, row-tile).

    Static tile geometry:
      wpp     : padded row width (W + 4)
      m1      : conv1 pseudo-columns per tile = (TH+2)*wpp
      m2      : conv2 pseudo-columns per tile = TH*wpp
      res_off : flat offset of the identity pixel for pseudo-column 0 (2*wpp+2)
    """
    offs = [dy * wpp + dx for dy in range(3) for dx in range(3)]

    def kernel(x_ref, w1_ref, b1_ref, m1_ref, w2_ref, b2_ref, o_ref, mid_ref):
        # x_ref  : (1,1,Cin,XCOLS)  bf16  flat (TH+4, wpp) window of 2-padded input
        # w1_ref : (9, Cmid, Cin)   bf16  conv1 weights (tap, out, in), bn1 folded
        # b1_ref : (Cmid, 1)        f32   bn1 folded bias
        # m1_ref : (1, 1, m1)       f32   per-tile 0/1 mask building conv1's pad frame
        # w2_ref : (9, Cout, Cmid)  bf16  conv2 weights, bn2 folded
        # b2_ref : (Cout, 1)        f32   bn2 folded bias
        # o_ref  : (1,1,Cout,m2)    bf16  output tile (flat (TH, wpp), junk cols kept)
        # mid_ref: (Cmid, MIDCOLS)  bf16  conv1 output, flat (TH+2, wpp) layout
        cmid = mid_ref.shape[0]
        midcols = mid_ref.shape[1]

        # ---- conv1 (3x3) + folded bn1 + relu --------------------------------
        acc1 = jnp.zeros((cmid, m1), jnp.float32)
        for t, off in enumerate(offs):
            tap = x_ref[0, 0, :, off:off + m1]                  # (Cin, m1) bf16
            acc1 = acc1 + jnp.dot(w1_ref[t], tap,
                                  preferred_element_type=jnp.float32)
        # Mask rebuilds conv1's zero padding frame (left/right cols + global
        # top/bottom rows) directly in the flat layout that conv2 reads.
        out1 = jnp.maximum(acc1 + b1_ref[...], 0.0) * m1_ref[0]
        mid_ref[:, :m1] = out1.astype(jnp.bfloat16)
        # Tail columns are only ever read by discarded junk output columns.
        mid_ref[:, m1:] = jnp.zeros((cmid, midcols - m1), jnp.bfloat16)

        # ---- conv2 (3x3) + folded bn2 + identity shortcut + relu ------------
        acc2 = x_ref[0, 0, :, res_off:res_off + m2].astype(jnp.float32) + b2_ref[...]
        for t, off in enumerate(offs):
            tap = mid_ref[:, off:off + m2]                      # (Cmid, m2) bf16
            acc2 = acc2 + jnp.dot(w2_ref[t], tap,
                                  preferred_element_type=jnp.float32)
        o_ref[0, 0] = jnp.maximum(acc2, 0.0).astype(jnp.bfloat16)

    return kernel


# ------------------------------- JAX glue ------------------------------------

def _fold_bn(gamma, beta, mean, var, eps=1e-5):
    scale = gamma / jnp.sqrt(var + eps)
    bias = beta - mean * scale
    return scale, bias


def _fold_weight(w_oihw, scale):
    """PyTorch (Cout, Cin, 3, 3) -> (9, Cout, Cin) tap-major GEMM LHS with the
    BN scale folded into the output channels, cast to bf16."""
    co, ci, kh, kw = w_oihw.shape
    w = w_oihw * scale[:, None, None, None]
    return jnp.transpose(w, (2, 3, 0, 1)).reshape(kh * kw, co, ci).astype(jnp.bfloat16)


def basic_block_forward(x_nchw, params, eps=1e-5, tile_h=8):
    """BasicBlock forward (eval-mode BN), identity shortcut, single fused kernel."""
    N, Cin, H, W = x_nchw.shape

    s1, b1 = _fold_bn(*params["bn1"], eps=eps)
    s2, b2 = _fold_bn(*params["bn2"], eps=eps)
    w1 = _fold_weight(params["w1"], s1)                      # (9, Cmid, Cin)
    w2 = _fold_weight(params["w2"], s2)                      # (9, Cout, Cmid)
    Cmid, Cout = w1.shape[1], w2.shape[1]
    assert Cin == Cout and Cmid == Cin, \
        "identity shortcut requires in_planes == planes"

    TH = min(tile_h, H)
    assert H % TH == 0, "H must be divisible by the row-tile size"
    NT = H // TH
    Wpp = W + 4                                   # 2-pixel pad on each side
    M1 = (TH + 2) * Wpp                           # conv1 pseudo-columns / tile
    M2 = TH * Wpp                                 # conv2 pseudo-columns / tile
    RES_OFF = 2 * Wpp + 2                         # identity pixel flat offset
    XCOLS = _round_up((TH + 4) * Wpp + 2, 128)    # lane-dense input tile width
    MIDCOLS = _round_up(M2 + 2 * Wpp + 2, 128)    # covers deepest conv2 tap read

    # --- wrapper-side layout plumbing (bf16 stream, flat lane-dense tiles) ---
    xpp = jnp.pad(x_nchw, ((0, 0), (0, 0), (2, 2), (2, 2))).astype(jnp.bfloat16)
    tiles = [xpp[:, :, t * TH: t * TH + TH + 4, :].reshape(N, Cin, (TH + 4) * Wpp)
             for t in range(NT)]
    xtiles = jnp.stack(tiles, axis=1)             # (N, NT, Cin, (TH+4)*Wpp)
    xtiles = jnp.pad(xtiles, ((0, 0), (0, 0), (0, 0),
                              (0, XCOLS - xtiles.shape[-1])))

    # Per-tile mask: 1 on interior mid positions, 0 on conv1's padding frame
    # (columns 0 / W+1..Wpp-1 and the global top/bottom rows of the mid frame).
    m1 = np.zeros((NT, 1, M1), np.float32)
    for t in range(NT):
        for r in range(TH + 2):
            gy = t * TH + r                       # global row in (H+2)-tall frame
            if gy < 1 or gy > H:
                continue
            m1[t, 0, r * Wpp + 1: r * Wpp + 1 + W] = 1.0
    m1 = jnp.asarray(m1)

    flops = 2 * 9 * N * NT * (Cin * Cmid * M1 + Cmid * Cout * M2)
    bytes_accessed = (xtiles.size * 2 + (w1.size + w2.size) * 2 + m1.size * 4
                      + (Cmid + Cout) * 4 + N * NT * Cout * M2 * 2)

    out = pl.pallas_call(
        _make_kernel(Wpp, M1, M2, RES_OFF),
        out_shape=jax.ShapeDtypeStruct((N, NT, Cout, M2), jnp.bfloat16),
        grid=(N, NT),
        in_specs=[
            pl.BlockSpec((1, 1, Cin, XCOLS), lambda n, t: (n, t, 0, 0)),
            pl.BlockSpec((9, Cmid, Cin), lambda n, t: (0, 0, 0)),
            pl.BlockSpec((Cmid, 1), lambda n, t: (0, 0)),
            pl.BlockSpec((1, 1, M1), lambda n, t: (t, 0, 0)),
            pl.BlockSpec((9, Cout, Cmid), lambda n, t: (0, 0, 0)),
            pl.BlockSpec((Cout, 1), lambda n, t: (0, 0)),
        ],
        out_specs=pl.BlockSpec((1, 1, Cout, M2), lambda n, t: (n, t, 0, 0)),
        scratch_shapes=[pltpu.VMEM((Cmid, MIDCOLS), jnp.bfloat16)],
        compiler_params=pltpu.CompilerParams(
            dimension_semantics=("parallel", "parallel"),
            vmem_limit_bytes=32 * 1024 * 1024,    # re-derive for real sizes / v7x
        ),
        cost_estimate=pl.CostEstimate(flops=flops, transcendentals=0,
                                      bytes_accessed=bytes_accessed),
    )(xtiles, w1, b1.reshape(Cmid, 1).astype(jnp.float32),
      m1, w2, b2.reshape(Cout, 1).astype(jnp.float32))

    # Drop the junk (padding-width) columns and restore NCHW. A following block
    # could consume the bf16 slab directly; cast back to f32 here to match the
    # reference module's output dtype.
    out = out.reshape(N, NT, Cout, TH, Wpp)[:, :, :, :, :W]
    out = jnp.transpose(out, (0, 2, 1, 3, 4)).reshape(N, Cout, H, W)
    return out.astype(jnp.float32)


# ------------------------------ reference ------------------------------------

def reference_forward(x, params, eps=1e-5):
    def conv3x3(x, w):
        return jax.lax.conv_general_dilated(
            x, w, window_strides=(1, 1), padding=((1, 1), (1, 1)),
            dimension_numbers=("NCHW", "OIHW", "NCHW"))

    def bn(x, g, b, m, v):
        return ((x - m[None, :, None, None]) / jnp.sqrt(v[None, :, None, None] + eps)
                * g[None, :, None, None] + b[None, :, None, None])

    out = jax.nn.relu(bn(conv3x3(x, params["w1"]), *params["bn1"]))
    out = bn(conv3x3(out, params["w2"]), *params["bn2"])
    out = out + x
    return jax.nn.relu(out)


# --------------------------------- main ---------------------------------------

if __name__ == "__main__":
    in_planes, planes, stride = 4, 4, 1
    assert stride == 1 and in_planes == planes, "only identity-shortcut config implemented"

    N, H, W = 2, 16, 16
    key = jax.random.PRNGKey(0)
    ks = jax.random.split(key, 12)

    params = {
        "w1": 0.1 * jax.random.normal(ks[0], (planes, in_planes, 3, 3), jnp.float32),
        "w2": 0.1 * jax.random.normal(ks[1], (planes, planes, 3, 3), jnp.float32),
        "bn1": (jax.random.uniform(ks[2], (planes,), jnp.float32, 0.5, 1.5),   # gamma
                0.1 * jax.random.normal(ks[3], (planes,), jnp.float32),        # beta
                0.1 * jax.random.normal(ks[4], (planes,), jnp.float32),        # running_mean
                jax.random.uniform(ks[5], (planes,), jnp.float32, 0.5, 1.5)),  # running_var
        "bn2": (jax.random.uniform(ks[6], (planes,), jnp.float32, 0.5, 1.5),
                0.1 * jax.random.normal(ks[7], (planes,), jnp.float32),
                0.1 * jax.random.normal(ks[8], (planes,), jnp.float32),
                jax.random.uniform(ks[9], (planes,), jnp.float32, 0.5, 1.5)),
    }

    x = jax.random.normal(ks[10], (N, in_planes, H, W), jnp.float32)

    out = jax.block_until_ready(basic_block_forward(x, params))
    ref = jax.block_until_ready(reference_forward(x, params))

    assert out.shape == (N, planes, H, W), out.shape
    # Tolerance covers bf16 rounding of weights/activations/mid/output fed
    # through the MXU (accumulation is f32); structural bugs show up as O(0.5+).
    np.testing.assert_allclose(np.asarray(out), np.asarray(ref), atol=5e-2, rtol=5e-2)
    print("KERNEL_OK")
</pallas_src>

<mosaic_0001>
module attributes {stable_mosaic.version = 11 : i64} {
  func.func @kernel(%arg0: i32, %arg1: i32, %arg2: memref<1x1x4x256xbf16, #tpu.memory_space<vmem>>, %arg3: memref<9x4x4xbf16, #tpu.memory_space<vmem>>, %arg4: memref<4x1xf32, #tpu.memory_space<vmem>>, %arg5: memref<1x1x200xf32, #tpu.memory_space<vmem>>, %arg6: memref<9x4x4xbf16, #tpu.memory_space<vmem>>, %arg7: memref<4x1xf32, #tpu.memory_space<vmem>>, %arg8: memref<1x1x4x160xbf16, #tpu.memory_space<vmem>>, %arg9: memref<4x256xbf16, #tpu.memory_space<vmem>>) attributes {dimension_semantics = [#tpu.dimension_semantics<parallel>, #tpu.dimension_semantics<parallel>], iteration_bounds = array<i64: 2, 2>, scalar_prefetch = 0 : i64, scratch_operands = 1 : i64, tpu.core_type = #tpu.core_type<tc>, window_params = [{transform_indices = @transform_0, window_bounds = array<i64: 1, 1, 4, 256>}, {pipeline_mode = #tpu.pipeline_mode<synchronous>, transform_indices = @transform_1, window_bounds = array<i64: 9, 4, 4>}, {pipeline_mode = #tpu.pipeline_mode<synchronous>, transform_indices = @transform_2, window_bounds = array<i64: 4, 1>}, {transform_indices = @transform_3, window_bounds = array<i64: 1, 1, 200>}, {pipeline_mode = #tpu.pipeline_mode<synchronous>, transform_indices = @transform_4, window_bounds = array<i64: 9, 4, 4>}, {pipeline_mode = #tpu.pipeline_mode<synchronous>, transform_indices = @transform_5, window_bounds = array<i64: 4, 1>}, {transform_indices = @transform_6, window_bounds = array<i64: 1, 1, 4, 160>}]} {
    %cst = arith.constant 0.000000e+00 : f32
    %0 = vector.broadcast %cst : f32 to vector<4x200xf32>
    %c0 = arith.constant 0 : index
    %c0_0 = arith.constant 0 : index
    %c0_1 = arith.constant 0 : index
    %c0_2 = arith.constant 0 : index
    %1 = vector.load %arg2[%c0, %c0_0, %c0_1, %c0_2] : memref<1x1x4x256xbf16, #tpu.memory_space<vmem>>, vector<1x1x4x200xbf16>
    %2 = vector.shape_cast %1 : vector<1x1x4x200xbf16> to vector<4x200xbf16>
    %c0_3 = arith.constant 0 : index
    %c0_4 = arith.constant 0 : index
    %c0_5 = arith.constant 0 : index
    %3 = vector.load %arg3[%c0_3, %c0_4, %c0_5] : memref<9x4x4xbf16, #tpu.memory_space<vmem>>, vector<1x4x4xbf16>
    %4 = vector.shape_cast %3 : vector<1x4x4xbf16> to vector<4x4xbf16>
    %cst_6 = arith.constant dense<0.000000e+00> : vector<4x200xf32>
    %5 = tpu.matmul %4, %2, %cst_6 {dimension_numbers = #tpu.dot_dimension_numbers<[1], [0], [0], [1], [0, 0, 1, 1], [], []>} : vector<4x4xbf16>, vector<4x200xbf16>, vector<4x200xf32> -> vector<4x200xf32>
    %6 = arith.addf %0, %5 : vector<4x200xf32>
    %c0_7 = arith.constant 0 : index
    %c0_8 = arith.constant 0 : index
    %c0_9 = arith.constant 0 : index
    %c1 = arith.constant 1 : index
    %7 = vector.load %arg2[%c0_7, %c0_8, %c0_9, %c1] : memref<1x1x4x256xbf16, #tpu.memory_space<vmem>>, vector<1x1x4x200xbf16>
    %8 = vector.shape_cast %7 : vector<1x1x4x200xbf16> to vector<4x200xbf16>
    %c1_10 = arith.constant 1 : index
    %c0_11 = arith.constant 0 : index
    %c0_12 = arith.constant 0 : index
    %9 = vector.load %arg3[%c1_10, %c0_11, %c0_12] : memref<9x4x4xbf16, #tpu.memory_space<vmem>>, vector<1x4x4xbf16>
    %10 = vector.shape_cast %9 : vector<1x4x4xbf16> to vector<4x4xbf16>
    %cst_13 = arith.constant dense<0.000000e+00> : vector<4x200xf32>
    %11 = tpu.matmul %10, %8, %cst_13 {dimension_numbers = #tpu.dot_dimension_numbers<[1], [0], [0], [1], [0, 0, 1, 1], [], []>} : vector<4x4xbf16>, vector<4x200xbf16>, vector<4x200xf32> -> vector<4x200xf32>
    %12 = arith.addf %6, %11 : vector<4x200xf32>
    %c0_14 = arith.constant 0 : index
    %c0_15 = arith.constant 0 : index
    %c0_16 = arith.constant 0 : index
    %c2 = arith.constant 2 : index
    %13 = vector.load %arg2[%c0_14, %c0_15, %c0_16, %c2] : memref<1x1x4x256xbf16, #tpu.memory_space<vmem>>, vector<1x1x4x200xbf16>
    %14 = vector.shape_cast %13 : vector<1x1x4x200xbf16> to vector<4x200xbf16>
    %c2_17 = arith.constant 2 : index
    %c0_18 = arith.constant 0 : index
    %c0_19 = arith.constant 0 : index
    %15 = vector.load %arg3[%c2_17, %c0_18, %c0_19] : memref<9x4x4xbf16, #tpu.memory_space<vmem>>, vector<1x4x4xbf16>
    %16 = vector.shape_cast %15 : vector<1x4x4xbf16> to vector<4x4xbf16>
    %cst_20 = arith.constant dense<0.000000e+00> : vector<4x200xf32>
    %17 = tpu.matmul %16, %14, %cst_20 {dimension_numbers = #tpu.dot_dimension_numbers<[1], [0], [0], [1], [0, 0, 1, 1], [], []>} : vector<4x4xbf16>, vector<4x200xbf16>, vector<4x200xf32> -> vector<4x200xf32>
    %18 = arith.addf %12, %17 : vector<4x200xf32>
    %c0_21 = arith.constant 0 : index
    %c0_22 = arith.constant 0 : index
    %c0_23 = arith.constant 0 : index
    %c20 = arith.constant 20 : index
    %19 = vector.load %arg2[%c0_21, %c0_22, %c0_23, %c20] : memref<1x1x4x256xbf16, #tpu.memory_space<vmem>>, vector<1x1x4x200xbf16>
    %20 = vector.shape_cast %19 : vector<1x1x4x200xbf16> to vector<4x200xbf16>
    %c3 = arith.constant 3 : index
    %c0_24 = arith.constant 0 : index
    %c0_25 = arith.constant 0 : index
    %21 = vector.load %arg3[%c3, %c0_24, %c0_25] : memref<9x4x4xbf16, #tpu.memory_space<vmem>>, vector<1x4x4xbf16>
    %22 = vector.shape_cast %21 : vector<1x4x4xbf16> to vector<4x4xbf16>
    %cst_26 = arith.constant dense<0.000000e+00> : vector<4x200xf32>
    %23 = tpu.matmul %22, %20, %cst_26 {dimension_numbers = #tpu.dot_dimension_numbers<[1], [0], [0], [1], [0, 0, 1, 1], [], []>} : vector<4x4xbf16>, vector<4x200xbf16>, vector<4x200xf32> -> vector<4x200xf32>
    %24 = arith.addf %18, %23 : vector<4x200xf32>
    %c0_27 = arith.constant 0 : index
    %c0_28 = arith.constant 0 : index
    %c0_29 = arith.constant 0 : index
    %c21 = arith.constant 21 : index
    %25 = vector.load %arg2[%c0_27, %c0_28, %c0_29, %c21] : memref<1x1x4x256xbf16, #tpu.memory_space<vmem>>, vector<1x1x4x200xbf16>
    %26 = vector.shape_cast %25 : vector<1x1x4x200xbf16> to vector<4x200xbf16>
    %c4 = arith.constant 4 : index
    %c0_30 = arith.constant 0 : index
    %c0_31 = arith.constant 0 : index
    %27 = vector.load %arg3[%c4, %c0_30, %c0_31] : memref<9x4x4xbf16, #tpu.memory_space<vmem>>, vector<1x4x4xbf16>
    %28 = vector.shape_cast %27 : vector<1x4x4xbf16> to vector<4x4xbf16>
    %cst_32 = arith.constant dense<0.000000e+00> : vector<4x200xf32>
    %29 = tpu.matmul %28, %26, %cst_32 {dimension_numbers = #tpu.dot_dimension_numbers<[1], [0], [0], [1], [0, 0, 1, 1], [], []>} : vector<4x4xbf16>, vector<4x200xbf16>, vector<4x200xf32> -> vector<4x200xf32>
    %30 = arith.addf %24, %29 : vector<4x200xf32>
    %c0_33 = arith.constant 0 : index
    %c0_34 = arith.constant 0 : index
    %c0_35 = arith.constant 0 : index
    %c22 = arith.constant 22 : index
    %31 = vector.load %arg2[%c0_33, %c0_34, %c0_35, %c22] : memref<1x1x4x256xbf16, #tpu.memory_space<vmem>>, vector<1x1x4x200xbf16>
    %32 = vector.shape_cast %31 : vector<1x1x4x200xbf16> to vector<4x200xbf16>
    %c5 = arith.constant 5 : index
    %c0_36 = arith.constant 0 : index
    %c0_37 = arith.constant 0 : index
    %33 = vector.load %arg3[%c5, %c0_36, %c0_37] : memref<9x4x4xbf16, #tpu.memory_space<vmem>>, vector<1x4x4xbf16>
    %34 = vector.shape_cast %33 : vector<1x4x4xbf16> to vector<4x4xbf16>
    %cst_38 = arith.constant dense<0.000000e+00> : vector<4x200xf32>
    %35 = tpu.matmul %34, %32, %cst_38 {dimension_numbers = #tpu.dot_dimension_numbers<[1], [0], [0], [1], [0, 0, 1, 1], [], []>} : vector<4x4xbf16>, vector<4x200xbf16>, vector<4x200xf32> -> vector<4x200xf32>
    %36 = arith.addf %30, %35 : vector<4x200xf32>
    %c0_39 = arith.constant 0 : index
    %c0_40 = arith.constant 0 : index
    %c0_41 = arith.constant 0 : index
    %c40 = arith.constant 40 : index
    %37 = vector.load %arg2[%c0_39, %c0_40, %c0_41, %c40] : memref<1x1x4x256xbf16, #tpu.memory_space<vmem>>, vector<1x1x4x200xbf16>
    %38 = vector.shape_cast %37 : vector<1x1x4x200xbf16> to vector<4x200xbf16>
    %c6 = arith.constant 6 : index
    %c0_42 = arith.constant 0 : index
    %c0_43 = arith.constant 0 : index
    %39 = vector.load %arg3[%c6, %c0_42, %c0_43] : memref<9x4x4xbf16, #tpu.memory_space<vmem>>, vector<1x4x4xbf16>
    %40 = vector.shape_cast %39 : vector<1x4x4xbf16> to vector<4x4xbf16>
    %cst_44 = arith.constant dense<0.000000e+00> : vector<4x200xf32>
    %41 = tpu.matmul %40, %38, %cst_44 {dimension_numbers = #tpu.dot_dimension_numbers<[1], [0], [0], [1], [0, 0, 1, 1], [], []>} : vector<4x4xbf16>, vector<4x200xbf16>, vector<4x200xf32> -> vector<4x200xf32>
    %42 = arith.addf %36, %41 : vector<4x200xf32>
    %c0_45 = arith.constant 0 : index
    %c0_46 = arith.constant 0 : index
    %c0_47 = arith.constant 0 : index
    %c41 = arith.constant 41 : index
    %43 = vector.load %arg2[%c0_45, %c0_46, %c0_47, %c41] : memref<1x1x4x256xbf16, #tpu.memory_space<vmem>>, vector<1x1x4x200xbf16>
    %44 = vector.shape_cast %43 : vector<1x1x4x200xbf16> to vector<4x200xbf16>
    %c7 = arith.constant 7 : index
    %c0_48 = arith.constant 0 : index
    %c0_49 = arith.constant 0 : index
    %45 = vector.load %arg3[%c7, %c0_48, %c0_49] : memref<9x4x4xbf16, #tpu.memory_space<vmem>>, vector<1x4x4xbf16>
    %46 = vector.shape_cast %45 : vector<1x4x4xbf16> to vector<4x4xbf16>
    %cst_50 = arith.constant dense<0.000000e+00> : vector<4x200xf32>
    %47 = tpu.matmul %46, %44, %cst_50 {dimension_numbers = #tpu.dot_dimension_numbers<[1], [0], [0], [1], [0, 0, 1, 1], [], []>} : vector<4x4xbf16>, vector<4x200xbf16>, vector<4x200xf32> -> vector<4x200xf32>
    %48 = arith.addf %42, %47 : vector<4x200xf32>
    %c0_51 = arith.constant 0 : index
    %c0_52 = arith.constant 0 : index
    %c0_53 = arith.constant 0 : index
    %c42 = arith.constant 42 : index
    %49 = vector.load %arg2[%c0_51, %c0_52, %c0_53, %c42] : memref<1x1x4x256xbf16, #tpu.memory_space<vmem>>, vector<1x1x4x200xbf16>
    %50 = vector.shape_cast %49 : vector<1x1x4x200xbf16> to vector<4x200xbf16>
    %c8 = arith.constant 8 : index
    %c0_54 = arith.constant 0 : index
    %c0_55 = arith.constant 0 : index
    %51 = vector.load %arg3[%c8, %c0_54, %c0_55] : memref<9x4x4xbf16, #tpu.memory_space<vmem>>, vector<1x4x4xbf16>
    %52 = vector.shape_cast %51 : vector<1x4x4xbf16> to vector<4x4xbf16>
    %cst_56 = arith.constant dense<0.000000e+00> : vector<4x200xf32>
    %53 = tpu.matmul %52, %50, %cst_56 {dimension_numbers = #tpu.dot_dimension_numbers<[1], [0], [0], [1], [0, 0, 1, 1], [], []>} : vector<4x4xbf16>, vector<4x200xbf16>, vector<4x200xf32> -> vector<4x200xf32>
    %54 = arith.addf %48, %53 : vector<4x200xf32>
    %c0_57 = arith.constant 0 : index
    %c0_58 = arith.constant 0 : index
    %55 = vector.load %arg4[%c0_57, %c0_58] : memref<4x1xf32, #tpu.memory_space<vmem>>, vector<4x1xf32>
    %56 = vector.broadcast %55 : vector<4x1xf32> to vector<4x200xf32>
    %57 = arith.addf %54, %56 : vector<4x200xf32>
    %cst_59 = arith.constant 0.000000e+00 : f32
    %58 = vector.broadcast %cst_59 : f32 to vector<4x200xf32>
    %59 = arith.maximumf %57, %58 : vector<4x200xf32>
    %c0_60 = arith.constant 0 : index
    %c0_61 = arith.constant 0 : index
    %c0_62 = arith.constant 0 : index
    %60 = vector.load %arg5[%c0_60, %c0_61, %c0_62] : memref<1x1x200xf32, #tpu.memory_space<vmem>>, vector<1x1x200xf32>
    %61 = vector.shape_cast %60 : vector<1x1x200xf32> to vector<1x200xf32>
    %62 = vector.broadcast %61 : vector<1x200xf32> to vector<4x200xf32>
    %63 = arith.mulf %59, %62 : vector<4x200xf32>
    %64 = arith.truncf %63 : vector<4x200xf32> to vector<4x200xbf16>
    %c0_63 = arith.constant 0 : index
    %c0_64 = arith.constant 0 : index
    %65 = vector.load %arg9[%c0_63, %c0_64] : memref<4x256xbf16, #tpu.memory_space<vmem>>, vector<4x200xbf16>
    tpu.vector_store %arg9[%c0_63, %c0_64], %64 {strides = array<i32>} : memref<4x256xbf16, #tpu.memory_space<vmem>>, vector<4x200xbf16>,
    %cst_65 = arith.constant 0.000000e+00 : bf16
    %66 = vector.broadcast %cst_65 : bf16 to vector<4x56xbf16>
    %c0_66 = arith.constant 0 : index
    %c200 = arith.constant 200 : index
    %67 = vector.load %arg9[%c0_66, %c200] : memref<4x256xbf16, #tpu.memory_space<vmem>>, vector<4x56xbf16>
    tpu.vector_store %arg9[%c0_66, %c200], %66 {strides = array<i32>} : memref<4x256xbf16, #tpu.memory_space<vmem>>, vector<4x56xbf16>,
    %c0_67 = arith.constant 0 : index
    %c0_68 = arith.constant 0 : index
    %c0_69 = arith.constant 0 : index
    %c42_70 = arith.constant 42 : index
    %68 = vector.load %arg2[%c0_67, %c0_68, %c0_69, %c42_70] : memref<1x1x4x256xbf16, #tpu.memory_space<vmem>>, vector<1x1x4x160xbf16>
    %69 = vector.shape_cast %68 : vector<1x1x4x160xbf16> to vector<4x160xbf16>
    %70 = arith.extf %69 : vector<4x160xbf16> to vector<4x160xf32>
    %c0_71 = arith.constant 0 : index
    %c0_72 = arith.constant 0 : index
    %71 = vector.load %arg7[%c0_71, %c0_72] : memref<4x1xf32, #tpu.memory_space<vmem>>, vector<4x1xf32>
    %72 = vector.broadcast %71 : vector<4x1xf32> to vector<4x160xf32>
    %73 = arith.addf %70, %72 : vector<4x160xf32>
    %c0_73 = arith.constant 0 : index
    %c0_74 = arith.constant 0 : index
    %74 = vector.load %arg9[%c0_73, %c0_74] : memref<4x256xbf16, #tpu.memory_space<vmem>>, vector<4x160xbf16>
    %c0_75 = arith.constant 0 : index
    %c0_76 = arith.constant 0 : index
    %c0_77 = arith.constant 0 : index
    %75 = vector.load %arg6[%c0_75, %c0_76, %c0_77] : memref<9x4x4xbf16, #tpu.memory_space<vmem>>, vector<1x4x4xbf16>
    %76 = vector.shape_cast %75 : vector<1x4x4xbf16> to vector<4x4xbf16>
    %cst_78 = arith.constant dense<0.000000e+00> : vector<4x160xf32>
    %77 = tpu.matmul %76, %74, %cst_78 {dimension_numbers = #tpu.dot_dimension_numbers<[1], [0], [0], [1], [0, 0, 1, 1], [], []>} : vector<4x4xbf16>, vector<4x160xbf16>, vector<4x160xf32> -> vector<4x160xf32>
    %78 = arith.addf %73, %77 : vector<4x160xf32>
    %c0_79 = arith.constant 0 : index
    %c1_80 = arith.constant 1 : index
    %79 = vector.load %arg9[%c0_79, %c1_80] : memref<4x256xbf16, #tpu.memory_space<vmem>>, vector<4x160xbf16>
    %c1_81 = arith.constant 1 : index
    %c0_82 = arith.constant 0 : index
    %c0_83 = arith.constant 0 : index
    %80 = vector.load %arg6[%c1_81, %c0_82, %c0_83] : memref<9x4x4xbf16, #tpu.memory_space<vmem>>, vector<1x4x4xbf16>
    %81 = vector.shape_cast %80 : vector<1x4x4xbf16> to vector<4x4xbf16>
    %cst_84 = arith.constant dense<0.000000e+00> : vector<4x160xf32>
    %82 = tpu.matmul %81, %79, %cst_84 {dimension_numbers = #tpu.dot_dimension_numbers<[1], [0], [0], [1], [0, 0, 1, 1], [], []>} : vector<4x4xbf16>, vector<4x160xbf16>, vector<4x160xf32> -> vector<4x160xf32>
    %83 = arith.addf %78, %82 : vector<4x160xf32>
    %c0_85 = arith.constant 0 : index
    %c2_86 = arith.constant 2 : index
    %84 = vector.load %arg9[%c0_85, %c2_86] : memref<4x256xbf16, #tpu.memory_space<vmem>>, vector<4x160xbf16>
    %c2_87 = arith.constant 2 : index
    %c0_88 = arith.constant 0 : index
    %c0_89 = arith.constant 0 : index
    %85 = vector.load %arg6[%c2_87, %c0_88, %c0_89] : memref<9x4x4xbf16, #tpu.memory_space<vmem>>, vector<1x4x4xbf16>
    %86 = vector.shape_cast %85 : vector<1x4x4xbf16> to vector<4x4xbf16>
    %cst_90 = arith.constant dense<0.000000e+00> : vector<4x160xf32>
    %87 = tpu.matmul %86, %84, %cst_90 {dimension_numbers = #tpu.dot_dimension_numbers<[1], [0], [0], [1], [0, 0, 1, 1], [], []>} : vector<4x4xbf16>, vector<4x160xbf16>, vector<4x160xf32> -> vector<4x160xf32>
    %88 = arith.addf %83, %87 : vector<4x160xf32>
    %c0_91 = arith.constant 0 : index
    %c20_92 = arith.constant 20 : index
    %89 = vector.load %arg9[%c0_91, %c20_92] : memref<4x256xbf16, #tpu.memory_space<vmem>>, vector<4x160xbf16>
    %c3_93 = arith.constant 3 : index
    %c0_94 = arith.constant 0 : index
    %c0_95 = arith.constant 0 : index
    %90 = vector.load %arg6[%c3_93, %c0_94, %c0_95] : memref<9x4x4xbf16, #tpu.memory_space<vmem>>, vector<1x4x4xbf16>
    %91 = vector.shape_cast %90 : vector<1x4x4xbf16> to vector<4x4xbf16>
    %cst_96 = arith.constant dense<0.000000e+00> : vector<4x160xf32>
    %92 = tpu.matmul %91, %89, %cst_96 {dimension_numbers = #tpu.dot_dimension_numbers<[1], [0], [0], [1], [0, 0, 1, 1], [], []>} : vector<4x4xbf16>, vector<4x160xbf16>, vector<4x160xf32> -> vector<4x160xf32>
    %93 = arith.addf %88, %92 : vector<4x160xf32>
    %c0_97 = arith.constant 0 : index
    %c21_98 = arith.constant 21 : index
    %94 = vector.load %arg9[%c0_97, %c21_98] : memref<4x256xbf16, #tpu.memory_space<vmem>>, vector<4x160xbf16>
    %c4_99 = arith.constant 4 : index
    %c0_100 = arith.constant 0 : index
    %c0_101 = arith.constant 0 : index
    %95 = vector.load %arg6[%c4_99, %c0_100, %c0_101] : memref<9x4x4xbf16, #tpu.memory_space<vmem>>, vector<1x4x4xbf16>
    %96 = vector.shape_cast %95 : vector<1x4x4xbf16> to vector<4x4xbf16>
    %cst_102 = arith.constant dense<0.000000e+00> : vector<4x160xf32>
    %97 = tpu.matmul %96, %94, %cst_102 {dimension_numbers = #tpu.dot_dimension_numbers<[1], [0], [0], [1], [0, 0, 1, 1], [], []>} : vector<4x4xbf16>, vector<4x160xbf16>, vector<4x160xf32> -> vector<4x160xf32>
    %98 = arith.addf %93, %97 : vector<4x160xf32>
    %c0_103 = arith.constant 0 : index
    %c22_104 = arith.constant 22 : index
    %99 = vector.load %arg9[%c0_103, %c22_104] : memref<4x256xbf16, #tpu.memory_space<vmem>>, vector<4x160xbf16>
    %c5_105 = arith.constant 5 : index
    %c0_106 = arith.constant 0 : index
    %c0_107 = arith.constant 0 : index
    %100 = vector.load %arg6[%c5_105, %c0_106, %c0_107] : memref<9x4x4xbf16, #tpu.memory_space<vmem>>, vector<1x4x4xbf16>
    %101 = vector.shape_cast %100 : vector<1x4x4xbf16> to vector<4x4xbf16>
    %cst_108 = arith.constant dense<0.000000e+00> : vector<4x160xf32>
    %102 = tpu.matmul %101, %99, %cst_108 {dimension_numbers = #tpu.dot_dimension_numbers<[1], [0], [0], [1], [0, 0, 1, 1], [], []>} : vector<4x4xbf16>, vector<4x160xbf16>, vector<4x160xf32> -> vector<4x160xf32>
    %103 = arith.addf %98, %102 : vector<4x160xf32>
    %c0_109 = arith.constant 0 : index
    %c40_110 = arith.constant 40 : index
    %104 = vector.load %arg9[%c0_109, %c40_110] : memref<4x256xbf16, #tpu.memory_space<vmem>>, vector<4x160xbf16>
    %c6_111 = arith.constant 6 : index
    %c0_112 = arith.constant 0 : index
    %c0_113 = arith.constant 0 : index
    %105 = vector.load %arg6[%c6_111, %c0_112, %c0_113] : memref<9x4x4xbf16, #tpu.memory_space<vmem>>, vector<1x4x4xbf16>
    %106 = vector.shape_cast %105 : vector<1x4x4xbf16> to vector<4x4xbf16>
    %cst_114 = arith.constant dense<0.000000e+00> : vector<4x160xf32>
    %107 = tpu.matmul %106, %104, %cst_114 {dimension_numbers = #tpu.dot_dimension_numbers<[1], [0], [0], [1], [0, 0, 1, 1], [], []>} : vector<4x4xbf16>, vector<4x160xbf16>, vector<4x160xf32> -> vector<4x160xf32>
    %108 = arith.addf %103, %107 : vector<4x160xf32>
    %c0_115 = arith.constant 0 : index
    %c41_116 = arith.constant 41 : index
    %109 = vector.load %arg9[%c0_115, %c41_116] : memref<4x256xbf16, #tpu.memory_space<vmem>>, vector<4x160xbf16>
    %c7_117 = arith.constant 7 : index
    %c0_118 = arith.constant 0 : index
    %c0_119 = arith.constant 0 : index
    %110 = vector.load %arg6[%c7_117, %c0_118, %c0_119] : memref<9x4x4xbf16, #tpu.memory_space<vmem>>, vector<1x4x4xbf16>
    %111 = vector.shape_cast %110 : vector<1x4x4xbf16> to vector<4x4xbf16>
    %cst_120 = arith.constant dense<0.000000e+00> : vector<4x160xf32>
    %112 = tpu.matmul %111, %109, %cst_120 {dimension_numbers = #tpu.dot_dimension_numbers<[1], [0], [0], [1], [0, 0, 1, 1], [], []>} : vector<4x4xbf16>, vector<4x160xbf16>, vector<4x160xf32> -> vector<4x160xf32>
    %113 = arith.addf %108, %112 : vector<4x160xf32>
    %c0_121 = arith.constant 0 : index
    %c42_122 = arith.constant 42 : index
    %114 = vector.load %arg9[%c0_121, %c42_122] : memref<4x256xbf16, #tpu.memory_space<vmem>>, vector<4x160xbf16>
    %c8_123 = arith.constant 8 : index
    %c0_124 = arith.constant 0 : index
    %c0_125 = arith.constant 0 : index
    %115 = vector.load %arg6[%c8_123, %c0_124, %c0_125] : memref<9x4x4xbf16, #tpu.memory_space<vmem>>, vector<1x4x4xbf16>
    %116 = vector.shape_cast %115 : vector<1x4x4xbf16> to vector<4x4xbf16>
    %cst_126 = arith.constant dense<0.000000e+00> : vector<4x160xf32>
    %117 = tpu.matmul %116, %114, %cst_126 {dimension_numbers = #tpu.dot_dimension_numbers<[1], [0], [0], [1], [0, 0, 1, 1], [], []>} : vector<4x4xbf16>, vector<4x160xbf16>, vector<4x160xf32> -> vector<4x160xf32>
    %118 = arith.addf %113, %117 : vector<4x160xf32>
    %cst_127 = arith.constant 0.000000e+00 : f32
    %119 = vector.broadcast %cst_127 : f32 to vector<4x160xf32>
    %120 = arith.maximumf %118, %119 : vector<4x160xf32>
    %121 = arith.truncf %120 : vector<4x160xf32> to vector<4x160xbf16>
    %c0_128 = arith.constant 0 : index
    %c0_129 = arith.constant 0 : index
    %c0_130 = arith.constant 0 : index
    %c0_131 = arith.constant 0 : index
    %122 = vector.load %arg8[%c0_128, %c0_129, %c0_130, %c0_131] : memref<1x1x4x160xbf16, #tpu.memory_space<vmem>>, vector<1x1x4x160xbf16>
    %123 = vector.shape_cast %122 : vector<1x1x4x160xbf16> to vector<4x160xbf16>
    %124 = vector.shape_cast %121 : vector<4x160xbf16> to vector<1x1x4x160xbf16>
    tpu.vector_store %arg8[%c0_128, %c0_129, %c0_130, %c0_131], %124 {strides = array<i32>} : memref<1x1x4x160xbf16, #tpu.memory_space<vmem>>, vector<1x1x4x160xbf16>,
    return
  }
  func.func @transform_0(%arg0: i32, %arg1: i32) -> (i32, i32, i32, i32) {
    %c0_i32 = arith.constant 0 : i32
    %c0_i32_0 = arith.constant 0 : i32
    %c0_i32_1 = arith.constant 0 : i32
    return %arg0, %arg1, %c0_i32, %c0_i32_0 : i32, i32, i32, i32
  }
  func.func @transform_1(%arg0: i32, %arg1: i32) -> (i32, i32, i32) {
    %c0_i32 = arith.constant 0 : i32
    %c0_i32_0 = arith.constant 0 : i32
    %c0_i32_1 = arith.constant 0 : i32
    %c0_i32_2 = arith.constant 0 : i32
    return %c0_i32, %c0_i32_0, %c0_i32_1 : i32, i32, i32
  }
  func.func @transform_2(%arg0: i32, %arg1: i32) -> (i32, i32) {
    %c0_i32 = arith.constant 0 : i32
    %c0_i32_0 = arith.constant 0 : i32
    %c0_i32_1 = arith.constant 0 : i32
    return %c0_i32, %c0_i32_0 : i32, i32
  }
  func.func @transform_3(%arg0: i32, %arg1: i32) -> (i32, i32, i32) {
    %c0_i32 = arith.constant 0 : i32
    %c0_i32_0 = arith.constant 0 : i32
    %c0_i32_1 = arith.constant 0 : i32
    return %arg1, %c0_i32, %c0_i32_0 : i32, i32, i32
  }
  func.func @transform_4(%arg0: i32, %arg1: i32) -> (i32, i32, i32) {
    %c0_i32 = arith.constant 0 : i32
    %c0_i32_0 = arith.constant 0 : i32
    %c0_i32_1 = arith.constant 0 : i32
    %c0_i32_2 = arith.constant 0 : i32
    return %c0_i32, %c0_i32_0, %c0_i32_1 : i32, i32, i32
  }
  func.func @transform_5(%arg0: i32, %arg1: i32) -> (i32, i32) {
    %c0_i32 = arith.constant 0 : i32
    %c0_i32_0 = arith.constant 0 : i32
    %c0_i32_1 = arith.constant 0 : i32
    return %c0_i32, %c0_i32_0 : i32, i32
  }
  func.func @transform_6(%arg0: i32, %arg1: i32) -> (i32, i32, i32, i32) {
    %c0_i32 = arith.constant 0 : i32
    %c0_i32_0 = arith.constant 0 : i32
    %c0_i32_1 = arith.constant 0 : i32
    return %arg0, %arg1, %c0_i32, %c0_i32_0 : i32, i32, i32, i32
  }
}

</mosaic_0001>

<bundles_post_ra>
// kernel: tpu_custom_call.1
= control target key start
LH: loop header
LB: loop body
LE: loop exit
PB: predicated region body
PF: predicated region fallthrough
CT: control target
= control target key end

     0   :  { %s2459_s0 = inlined_call_operand.vmem [shape: bf16[2,2,4,256], index: 0, kind: input, shape index: {}]   ;;  %s2460_s1 = inlined_call_operand.vmem [shape: bf16[9,4,4], index: 1, kind: input, shape index: {}]   ;;  %s2461_s2 = inlined_call_operand.vmem [shape: f32[4,1], index: 2, kind: input, shape index: {}]   ;;  %s2462_s3 = inlined_call_operand.vmem [shape: f32[2,1,200], index: 3, kind: input, shape index: {}]   ;;  %s2463_s4 = inlined_call_operand.vmem [shape: bf16[9,4,4], index: 4, kind: input, shape index: {}]   ;;  %s2464_s5 = inlined_call_operand.vmem [shape: f32[4,1], index: 5, kind: input, shape index: {}]   ;;  %s2465_s6 = inlined_call_operand.hbm [shape: bf16[2,2,4,160], index: 6, kind: output, shape index: {}]  }
   0x1   :  { %2474 = sst [smem:[#allocation6_spill]] %s2459_s0 }
   0x2   :  { %11 = vsyncpa [#allocation4], 0 }
   0x3   :  { %13 = vsyncpa [#allocation4 + $0x1], 0  ;;  %s2094_s21 = smov 0   ;;  %s2096_s22 = smov 0  }
   0x4   :  { %s2098_s23 = smov 0   ;;  %s2100_s24 = smov 0  }
   0x5   :  { %s2102_s25 = smov 0   ;;  %s2104_s26 = smov 0  }
   0x6   :  { %s2106_s27 = smov 0   ;;  %s2108_s28 = smov 0  }
   0x7 LB: > { %s1779_s29 = sadd.s32 4294967295, %s2044_s28   ;;  %s1780_s30 = sadd.s32 4294967294, %s2044_s28   ;;  %s2044_s28 = sphi %s2108_s28, %s19_s28   ;;  %s2040_s27 = sphi %s2106_s27, %s2488_s27   ;;  %s2036_s26 = sphi %s2104_s26, %s2487_s26   ;;  %s2032_s25 = sphi %s2102_s25, %s2486_s25   ;;  %s2028_s24 = sphi %s2100_s24, %s2485_s24   ;;  %s2024_s23 = sphi %s2098_s23, %s2484_s23   ;;  %s2020_s22 = sphi %s2096_s22, %s2483_s22   ;;  %s2016_s21 = sphi %s2094_s21, %s2482_s21  }
   0x8   : > { %s28_s7 = sadd.s32 1, %s2036_s26  ;;  %s31_s8 = sadd.s32 1, %s2040_s27 }
   0x9   : > { %p29_p0 = scmp.ge.s32.totalorder %s28_s7, 2  ;;  %p188_p1 = scmp.ne.s32.totalorder %s2024_s23, %s2020_s22 }
   0xa   : > { %p189_p2 = scmp.eq.s32.totalorder %s1779_s29, 3  ;;  %p194_p5 = scmp.ne.s32.totalorder %s2020_s22, %s2016_s21 }
   0xb   : > { %s2490_s7 = smov (%p29_p0, %s28_s7), 0  ;;  %s2492_s8 = smov (!%p29_p0, %s31_s8), %s2040_s27 }
   0xc   : > { %s174_s9 = ssub.s32 %s2036_s26, %s2490_s7  ;;  %p2145_p3 = por %p189_p2, %p188_p1 }
   0xd   : > { %p33_p4 = scmp.ge.s32.totalorder %s2492_s8, 2  ;;  %p195_p6 = scmp.eq.s32.totalorder %s1780_s30, 3 }
   0xe   : > { %p1783_p7 = scmp.ge.s32.totalorder %s2044_s28, 1  ;;  %p244_p9 = scmp.lt.s32.totalorder %s2044_s28, 5 }
   0xf   : > { %s2494_s8 = smov (%p33_p4, %s2492_s8), 0  ;;  %p2154_p8 = por %p195_p6, %p194_p5 }
  0x10   : > { %s173_s12 = ssub.s32 %s2040_s27, %s2494_s8  ;;  %s178_s13 = sadd.s32 1, %s2024_s23 }
  0x11   : > { %s175_s14 = sor.u32 %s174_s9, %s173_s12  ;;  %p245_p10 = pnand %p1783_p7, %p244_p9 }
  0x12   : > { %p176_p11 = scmp.eq.s32.totalorder %s175_s14, 0  ;;  %p282_p12 = scmp.lt.s32.totalorder (!%p245_p10), %s2032_s25, 1  ;;  %v2046_v0 = vmov (!%p245_p10), 0   ;;  %vm319_vm0 = vcmask (!%p245_p10), 1041408   ;;  %vm315_vm1 = vcmask (!%p245_p10), 31744   ;;  %vm313_vm2 = vcmask (!%p245_p10), 1039360  }
  0x13   : > { %248 = sbr.rel (%p245_p10) target bundleno = 1051 (0x41b), region = 44  ;;  %p284_p13 = scmp.lt.s32.totalorder (!%p245_p10), %s2028_s24, 1  ;;  %358 = vmatprep.mubr.bf16.mxu0 (!%p245_p10), %v2046_v0  ;;  %408 = vmatprep.mubr.bf16.mxu1 (!%p245_p10), %v2046_v0  ;;  %v297_v4 = vld [vmem:[%s2460_s1] sm:$0x3] (!%p245_p10)  ;;  %vm433_vm3 = vcmask (!%p245_p10), 1031168   ;;  %vm503_vm4 = vcmask (!%p245_p10), 883712  }
  0x14   : > { %s2163_s15 = scalar_select %p176_p11, %s2024_s23, %s178_s13  }
  0x15   : > { %1949 = vset.pattern.permute.xlu0 (!%p245_p10), %v2046_v0  ;;  %s2477_s0 = sld [smem:[#allocation6_spill]] (!%p245_p10)  ;;  %s2047_s13 = smov (!%p245_p10), 127   ;;  %v907_v5 = vld [vmem:[%s2461_s2] sm:$0xf] (!%p245_p10)  ;;  %vm573_vm5 = vcmask (!%p245_p10), 875520   ;;  %vm643_vm6 = vcmask (!%p245_p10), 867328  }
  0x16   : > { %s2048_s14 = smov (!%p245_p10), 126   ;;  %s2051_s30 = smov (!%p245_p10), 106   ;;  %v1789_v13 = vld [vmem:[%s2460_s1 + $0x2] sm:$0x3] (!%p245_p10)  ;;  %v1799_v21 = vld [vmem:[%s2460_s1 + $0x6] sm:$0x3] (!%p245_p10) }
  0x17   : > { %s2052_s9 = smov (!%p245_p10), 88   ;;  %v1795_v23 = vld [vmem:[%s2460_s1 + $0x4] sm:$0x3] (!%p245_p10)  ;;  %vm713_vm7 = vcmask (!%p245_p10), 719872   ;;  %v1807_v31 = vld [vmem:[%s2460_s1 + $0xa] sm:$0x3] (!%p245_p10) }
  0x18   : > { %vm783_vm8 = vcmask (!%p245_p10), 711680   ;;  %v1803_v33 = vld [vmem:[%s2460_s1 + $0x8] sm:$0x3] (!%p245_p10)  ;;  %vm853_vm9 = vcmask (!%p245_p10), 703488   ;;  %v1815_v41 = vld [vmem:[%s2460_s1 + $0xe] sm:$0x3] (!%p245_p10) }
  0x19   : > { %v1811_v43 = vld [vmem:[%s2460_s1 + $0xc] sm:$0x3] (!%p245_p10)  ;;  %v1819_v45 = vld [vmem:[%s2460_s1 + $0x10] sm:$0x3] (!%p245_p10)  ;;  %vm944_vm10 = vcmask (!%p245_p10), 584706   ;;  %vm947_vm12 = vcmask (!%p245_p10), 1041984  }
  0x1a   : > { %s283_s16 = scalar_select %p282_p12, %s2032_s25, 1  ;;  %vm945_vm11 = vmor %vm944_vm10, %vm319_vm0  ;;  %vm1032_vm13 = vcmask 343040   ;;  %vm1665_vm14 = vcmask 257026  }
  0x1b   : > { %s2169_s17 = scalar_select %p284_p13, %s2028_s24, 1  ;;  %vm1666_vm15 = vmor %vm1665_vm14, %vm319_vm0 }
  0x1c   : > { %s1786_s18 = sshll.u32 %s283_s16, 2  ;;  %s2472_s16 = smov 87  }
  0x1d   : > { %s1785_s19 = sshll.u32 %s2169_s17, 1 }
  0x1e   : > { %s288_s20 = sadd.s32 %s1786_s18, %s1785_s19  ;;  %s2470_s18 = smov 86  }
  0x1f   : > { %s1787_s29 = sshll.u32 %s288_s20, 1  ;;  %s2468_s20 = smov 108  }
  0x20   : > { %s2180_s12 = scalar_lea.vmem %s2477_s0, %s1787_s29  ;;  %s2466_s29 = smov 107  }
  0x21   : > { %v1790_v1 = vld.sshfl [vmem:[%s2180_s12] sm:$0x33 pattern:$0x76325410] }
  0x22   : > { %309 = vrot.lane.b32.xlu0 %v1790_v1, %s2047_s13  ;;  %429 = vrot.lane.b32.xlu1 %v1790_v1, %s2048_s14  ;;  %v428_v2 = vcombine.high %v1790_v1, %v1790_v1  ;;  %v371_v3 = vsel %vm319_vm0, %v1790_v1, 0 }
  0x24   : > { %1793 = vmatprep.subr.msk.bf16.mxu1 %vm319_vm0, %v428_v2 }
  0x25   : > { %377 = vmatpush1.bf16.msra.mxu1 %v371_v3 }
  0x26   : > { %311 = vrot.lane.b32.xlu0 %v428_v2, %s2047_s13  ;;  %431 = vrot.lane.b32.xlu1 %v428_v2, %s2048_s14 }
  0x28   : > { %1794 = vmatmul.mubr.msk.bf16.vlgmr.msra.gmra.mrb[0].mxu1 %vm315_vm1, %v297_v4 }
  0x29   : > { %546 = vmatprep.mubr.bf16.mxu1 %v2046_v0 }
  0x2a   : > { %501 = vrot.lane.b32.xlu1 %v428_v2, %s2468_s20  ;;  %499 = vrot.lane.b32.xlu0 %v1790_v1, %s2468_s20  ;;  %s2480_s20 = smov 87  }
  0x2e   : > { %571 = vrot.lane.b32.xlu1 %v428_v2, %s2466_s29  ;;  %569 = vrot.lane.b32.xlu0 %v1790_v1, %s2466_s29  ;;  %s2478_s29 = smov 108  }
  0x32   : > { %641 = vrot.lane.b32.xlu1 %v428_v2, %s2051_s30  ;;  %639 = vrot.lane.b32.xlu0 %v1790_v1, %s2051_s30 }
  0x36   : > { %711 = vrot.lane.b32.xlu1 %v428_v2, %s2052_s9  ;;  %709 = vrot.lane.b32.xlu0 %v1790_v1, %s2052_s9 }
  0x3a   : > { %781 = vrot.lane.b32.xlu1 %v428_v2, %s2472_s16  ;;  %779 = vrot.lane.b32.xlu0 %v1790_v1, %s2472_s16  ;;  %s294_s16 = scalar_lea.vmem %s2462_s3, %s1785_s19 }
  0x3e   : > { %851 = vrot.lane.b32.xlu1 %v428_v2, %s2470_s18  ;;  %849 = vrot.lane.b32.xlu0 %v1790_v1, %s2470_s18  ;;  %s2479_s18 = smov 107  }
  0x42   : > { %910 = vperm.xlu0 %1949, %v907_v5  }
  0x94   : > { %v310_v6 = vpop.permute.xlu0 %309  ;;  %v430_v7 = vpop.permute.xlu1 %429 }
  0x98   : > { %v312_v8 = vpop.permute.xlu0 %311  ;;  %v432_v9 = vpop.permute.xlu1 %431 }
  0x99   : > { %1791 = vmatprep.subr.msk.bf16.mxu0 %vm319_vm0, %v312_v8  ;;  %v314_v10 = vsel %vm313_vm2, %v310_v6, %v312_v8  ;;  %v434_v11 = vsel %vm433_vm3, %v430_v7, %v432_v9 }
  0x9a   : > { %v321_v12 = vsel %vm319_vm0, %v314_v10, 0  ;;  %v439_v14 = vsel %vm319_vm0, %v434_v11, 0 }
  0x9b   : > { %327 = vmatpush1.bf16.msra.mxu0 %v321_v12 }
  0x9c   : > { %1797 = vmatprep.subr.msk.bf16.mxu0 %vm319_vm0, %v432_v9  ;;  %v502_v15 = vpop.permute.xlu1 %501  ;;  %v500_v16 = vpop.permute.xlu0 %499 }
  0x9d   : > { %v504_v17 = vsel %vm503_vm4, %v500_v16, %v502_v15  ;;  %1801 = vmatprep.subr.msk.bf16.mxu1 %vm319_vm0, %v502_v15 }
  0x9e   : > { %1792 = vmatmul.mubr.msk.bf16.vlgmr.msra.gmra.mrb[0].mxu0 %vm315_vm1, %v1789_v13  ;;  %v509_v18 = vsel %vm319_vm0, %v504_v17, 0 }
  0x9f   : > { %445 = vmatpush1.bf16.msra.mxu0 %v439_v14  ;;  %476 = vmatprep.mubr.bf16.mxu0 %v2046_v0 }
  0xa0   : > { %515 = vmatpush1.bf16.msra.mxu1 %v509_v18  ;;  %v572_v19 = vpop.permute.xlu1 %571  ;;  %v570_v20 = vpop.permute.xlu0 %569 }
  0xa1   : > { %v574_v22 = vsel %vm573_vm5, %v570_v20, %v572_v19  ;;  %1805 = vmatprep.subr.msk.bf16.mxu0 %vm319_vm0, %v572_v19  ;;  %v919_v20 = vlaneseq }
  0xa2   : > { %v579_v24 = vsel %vm319_vm0, %v574_v22, 0 }
  0xa3   : > { %1802 = vmatmul.mubr.msk.bf16.vlgmr.msra.gmra.mrb[4].mxu1 %vm315_vm1, %v1799_v21 }
  0xa4   : > { %v642_v25 = vpop.permute.xlu1 %641  ;;  %v640_v26 = vpop.permute.xlu0 %639  ;;  %686 = vmatprep.mubr.bf16.mxu1 %v2046_v0 }
  0xa5   : > { %v644_v27 = vsel %vm643_vm6, %v640_v26, %v642_v25  ;;  %1809 = vmatprep.subr.msk.bf16.mxu1 %vm319_vm0, %v642_v25 }
  0xa6   : > { %1798 = vmatmul.mubr.msk.bf16.vlgmr.msra.gmra.mrb[4].mxu0 %vm315_vm1, %v1795_v23  ;;  %v649_v28 = vsel %vm319_vm0, %v644_v27, 0 }
  0xa7   : > { %585 = vmatpush1.bf16.msra.mxu0 %v579_v24  ;;  %616 = vmatprep.mubr.bf16.mxu0 %v2046_v0 }
  0xa8   : > { %655 = vmatpush1.bf16.msra.mxu1 %v649_v28  ;;  %v712_v29 = vpop.permute.xlu1 %711  ;;  %v710_v30 = vpop.permute.xlu0 %709 }
  0xa9   : > { %v714_v32 = vsel %vm713_vm7, %v710_v30, %v712_v29  ;;  %1813 = vmatprep.subr.msk.bf16.mxu0 %vm319_vm0, %v712_v29  ;;  %v2273_v29 = vshrl.u32 %v919_v20, 7 }
  0xaa   : > { %v719_v34 = vsel %vm319_vm0, %v714_v32, 0 }
  0xab   : > { %1810 = vmatmul.mubr.msk.bf16.vlgmr.msra.gmra.mrb[8].mxu1 %vm315_vm1, %v1807_v31  ;;  %v921_v31 = vsub.s32 0, %v2273_v29 }
  0xac   : > { %v782_v35 = vpop.permute.xlu1 %781  ;;  %v780_v36 = vpop.permute.xlu0 %779  ;;  %826 = vmatprep.mubr.bf16.mxu1 %v2046_v0 }
  0xad   : > { %v784_v37 = vsel %vm783_vm8, %v780_v36, %v782_v35  ;;  %1817 = vmatprep.subr.msk.bf16.mxu1 %vm319_vm0, %v782_v35  ;;  %v2055_v35 = vmov 1983009808  }
  0xae   : > { %1806 = vmatmul.mubr.msk.bf16.vlgmr.msra.gmra.mrb[8].mxu0 %vm315_vm1, %v1803_v33  ;;  %v789_v38 = vsel %vm319_vm0, %v784_v37, 0  ;;  %v917_v33 = vld [vmem:[%s294_s16] sm:$0x3]  ;;  %v937_v36 = vunpack.c.l.s4 %v2055_v35  ;;  %s2056_s16 = smov 42  }
  0xaf   : > { %725 = vmatpush1.bf16.msra.mxu0 %v719_v34  ;;  %756 = vmatprep.mubr.bf16.mxu0 %v2046_v0  ;;  %v925_v34 = vsub.s32 1, %v2273_v29 }
  0xb0   : > { %795 = vmatpush1.bf16.msra.mxu1 %v789_v38  ;;  %v852_v39 = vpop.permute.xlu1 %851  ;;  %v850_v40 = vpop.permute.xlu0 %849 }
  0xb1   : > { %v854_v42 = vsel %vm853_vm9, %v850_v40, %v852_v39  ;;  %1821 = vmatprep.subr.msk.bf16.mxu0 %vm319_vm0, %v852_v39 }
  0xb2   : > { %v859_v44 = vsel %vm319_vm0, %v854_v42, 0  ;;  %v922_v42 = vrot.slane %v917_v33, %v921_v31 }
  0xb3   : > { %1818 = vmatmul.mubr.msk.bf16.vlgmr.msra.gmra.mrb[12].mxu1 %vm315_vm1, %v1815_v41 }
  0xb4   : > { %1017 = vmatprep.mubr.bf16.mxu1 %v2046_v0 }
  0xb6   : > { %1814 = vmatmul.mubr.msk.bf16.vlgmr.msra.gmra.mrb[12].mxu0 %vm315_vm1, %v1811_v43 }
  0xb7   : > { %865 = vmatpush1.bf16.msra.mxu0 %v859_v44  ;;  %896 = vmatprep.mubr.bf16.mxu0 %v2046_v0 }
  0xbe   : > { %1822 = vmatmul.mubr.msk.bf16.vlgmr.msra.gmra.mrb[16].mxu0 %vm315_vm1, %v1819_v45  ;;  %v926_v45 = vrot.slane %v917_v33, %v925_v34 }
  0xbf   : > { %1094 = vmatprep.mubr.bf16.mxu0 %v2046_v0 }
  0xc1   : > { %v911_v37 = vpop.permute.xlu0 %910 }
  0xfb   : > { %v410_v46 = vpop.f32.mrb[0].mxu1 }
  0xfc   : > { %v412_v47 = vpop.f32.mrb[1].mxu1 }
  0xfd   : > { %v414_v48 = vpop.f32.mrb[2].mxu1 }
  0xfe   : > { %v415_v49 = vpop.f32.mrb[3].mxu1 }
 0x171   : > { %v360_v50 = vpop.f32.mrb[0].mxu0 }
 0x172   : > { %v411_v51 = vadd.f32 %v410_v46, %v360_v50  ;;  %v362_v52 = vpop.f32.mrb[1].mxu0  ;;  %v938_v46 = vunpack.c.0.s8 %v937_v36 }
 0x173   : > { %v413_v53 = vadd.f32 %v412_v47, %v362_v52  ;;  %v364_v54 = vpop.f32.mrb[2].mxu0 }
 0x174   : > { %v365_v55 = vpop.f32.mrb[3].mxu0 }
 0x176   : > { %v548_v56 = vpop.f32.mrb[4].mxu1 }
 0x177   : > { %v550_v57 = vpop.f32.mrb[5].mxu1 }
 0x178   : > { %v552_v58 = vpop.f32.mrb[6].mxu1 }
 0x179   : > { %v478_v59 = vpop.f32.mrb[4].mxu0  ;;  %v553_v60 = vpop.f32.mrb[7].mxu1  ;;  %v966_v58 = vld [vmem:[%s2463_s4] sm:$0x3] }
 0x17a   : > { %v485_v61 = vadd.f32 %v478_v59, %v411_v51  ;;  %v480_v62 = vpop.f32.mrb[5].mxu0  ;;  %v2283_v51 = vsub.s32 %v938_v46, %v2273_v29  ;;  %v951_v59 = vld [vmem:[%s2464_s5] sm:$0xf] }
 0x17b   : > { %v486_v63 = vadd.f32 %v480_v62, %v413_v53  ;;  %v482_v1 = vpop.f32.mrb[6].mxu0 }
 0x17c   : > { %v555_v2 = vadd.f32 %v548_v56, %v485_v61  ;;  %v483_v3 = vpop.f32.mrb[7].mxu0 }
 0x17d   : > { %v556_v4 = vadd.f32 %v550_v57, %v486_v63  ;;  %v1827_v3 = vld [vmem:[%s2463_s4 + $0x2] sm:$0x3] }
 0x17e   : > { %v688_v5 = vpop.f32.mrb[8].mxu1 }
 0x17f   : > { %v690_v6 = vpop.f32.mrb[9].mxu1 }
 0x180   : > { %v692_v7 = vpop.f32.mrb[10].mxu1 }
 0x181   : > { %v618_v8 = vpop.f32.mrb[8].mxu0  ;;  %v693_v9 = vpop.f32.mrb[11].mxu1 }
 0x182   : > { %v625_v10 = vadd.f32 %v618_v8, %v555_v2  ;;  %v620_v11 = vpop.f32.mrb[9].mxu0  ;;  %v1831_v8 = vld [vmem:[%s2463_s4 + $0x4] sm:$0x3] }
 0x183   : > { %v626_v12 = vadd.f32 %v620_v11, %v556_v4  ;;  %v622_v13 = vpop.f32.mrb[10].mxu0 }
 0x184   : > { %v695_v14 = vadd.f32 %v688_v5, %v625_v10  ;;  %v623_v15 = vpop.f32.mrb[11].mxu0  ;;  %v1835_v13 = vld [vmem:[%s2463_s4 + $0x6] sm:$0x3] }
 0x185   : > { %v696_v16 = vadd.f32 %v690_v6, %v626_v12 }
 0x186   : > { %v828_v17 = vpop.f32.mrb[12].mxu1 }
 0x187   : > { %v830_v18 = vpop.f32.mrb[13].mxu1 }
 0x188   : > { %v832_v19 = vpop.f32.mrb[14].mxu1 }
 0x189   : > { %v758_v21 = vpop.f32.mrb[12].mxu0  ;;  %v833_v22 = vpop.f32.mrb[15].mxu1 }
 0x18a   : > { %v765_v23 = vadd.f32 %v758_v21, %v695_v14  ;;  %v760_v24 = vpop.f32.mrb[13].mxu0  ;;  %v1843_v22 = vld [vmem:[%s2463_s4 + $0xa] sm:$0x3] }
 0x18b   : > { %v766_v25 = vadd.f32 %v760_v24, %v696_v16  ;;  %v762_v26 = vpop.f32.mrb[14].mxu0 }
 0x18c   : > { %v835_v27 = vadd.f32 %v828_v17, %v765_v23  ;;  %v763_v28 = vpop.f32.mrb[15].mxu0  ;;  %v1839_v17 = vld [vmem:[%s2463_s4 + $0x8] sm:$0x3] }
 0x18d   : > { %v836_v30 = vadd.f32 %v830_v18, %v766_v25 }
 0x191   : > { %v898_v32 = vpop.f32.mrb[16].mxu0 }
 0x192   : > { %v905_v38 = vadd.f32 %v898_v32, %v835_v27  ;;  %v900_v39 = vpop.f32.mrb[17].mxu0  ;;  %v1847_v27 = vld [vmem:[%s2463_s4 + $0xc] sm:$0x3]  ;;  %v1851_v32 = vld [vmem:[%s2463_s4 + $0xe] sm:$0x3] }
 0x193   : > { %v906_v40 = vadd.f32 %v900_v39, %v836_v30  ;;  %v902_v41 = vpop.f32.mrb[18].mxu0 }
 0x194   : > { %v913_v43 = vadd.f32 %v911_v37, %v905_v38  ;;  %v903_v44 = vpop.f32.mrb[19].mxu0 }
 0x195   : > { %v914_v47 = vadd.f32 %v911_v37, %v906_v40  ;;  %v1855_v37 = vld [vmem:[%s2463_s4 + $0x10] sm:$0x3] }
 0x196   : > { %v915_v48 = vmax.f32 %v913_v43, 0.0 }
 0x197   : > { %v916_v49 = vmax.f32 %v914_v47, 0.0 }
 0x198   : > { %v929_v50 = vmul.f32 %v922_v42, %v915_v48 }
 0x199   : > { %v930_v52 = vmul.f32 %v926_v45, %v916_v49 }
 0x19b   : > { %v1823_v53 = vpack.c.bf16 %v930_v52, %v929_v50 }
 0x19d   : > { %v942_v54 = vrot.slane %v1823_v53, %v2283_v51 }
 0x19f   : > { %946 = vst.msk [vmem:[#allocation2] sm:$0xf] %vm945_vm11, %v942_v54 }
 0x1a0   : > { %948 = vst.msk [vmem:[#allocation2 + $0x2] sm:$0x3] %vm947_vm12, %v2046_v0 }
 0x1a7   : > { %v1832_v55 = vld.sshfl [vmem:[#allocation2] sm:$0x33 pattern:$0x76325410] }
 0x1a8   : > { %1124 = vrot.lane.b32.xlu0 %v1832_v55, %s2048_s14  ;;  %v1123_v56 = vcombine.high %v1832_v55, %v1832_v55  ;;  %1048 = vrot.lane.b32.xlu1 %v1832_v55, %s2047_s13  ;;  %v980_v57 = vsel %vm319_vm0, %v1832_v55, 0 }
 0x1aa   : > { %1825 = vmatprep.subr.msk.bf16.mxu1 %vm319_vm0, %v1123_v56 }
 0x1ab   : > { %986 = vmatpush1.bf16.msra.mxu1 %v980_v57 }
 0x1ac   : > { %1200 = vrot.lane.b32.xlu0 %v1832_v55, %s2478_s29  ;;  %1050 = vrot.lane.b32.xlu1 %v1123_v56, %s2047_s13  ;;  %s2481_s13 = smov 86  }
 0x1ae   : > { %1826 = vmatmul.mubr.msk.bf16.vlgmr.msra.gmra.mrb[16].mxu1 %vm315_vm1, %v966_v58 }
 0x1af   : > { %1170 = vmatprep.mubr.bf16.mxu1 %v2046_v0 }
 0x1b0   : > { %1276 = vrot.lane.b32.xlu0 %v1832_v55, %s2479_s18  ;;  %1126 = vrot.lane.b32.xlu1 %v1123_v56, %s2048_s14  ;;  %s1861_s14 = sshll.u32 %s2028_s24, 1 }
 0x1b4   : > { %1352 = vrot.lane.b32.xlu0 %v1832_v55, %s2051_s30  ;;  %1202 = vrot.lane.b32.xlu1 %v1123_v56, %s2478_s29 }
 0x1b8   : > { %1428 = vrot.lane.b32.xlu0 %v1832_v55, %s2052_s9  ;;  %1278 = vrot.lane.b32.xlu1 %v1123_v56, %s2479_s18 }
 0x1bc   : > { %1504 = vrot.lane.b32.xlu0 %v1832_v55, %s2480_s20  ;;  %1354 = vrot.lane.b32.xlu1 %v1123_v56, %s2051_s30  ;;  %s1862_s30 = sshll.u32 %s2032_s25, 2 }
 0x1c0   : > { %1580 = vrot.lane.b32.xlu0 %v1832_v55, %s2481_s13  ;;  %1430 = vrot.lane.b32.xlu1 %v1123_v56, %s2052_s9  ;;  %s1681_s9 = sadd.s32 %s1862_s30, %s1861_s14 }
 0x1c1   : > { %s1863_s19 = sshll.u32 %s1681_s9, 5 }
 0x1c2   : > { %s2405_s0 = scalar_lea.hbm %s2465_s6, %s1863_s19 }
 0x1c4   : > { %954 = vperm.xlu0 %1949, %v951_v59   ;;  %1506 = vrot.lane.b32.xlu1 %v1123_v56, %s2480_s20 }
 0x1c8   : > { %1582 = vrot.lane.b32.xlu1 %v1123_v56, %s2481_s13 }
 0x21a   : > { %v1125_v60 = vpop.permute.xlu0 %1124  ;;  %v1049_v61 = vpop.permute.xlu1 %1048 }
 0x21e   : > { %v1201_v62 = vpop.permute.xlu0 %1200  ;;  %v1051_v63 = vpop.permute.xlu1 %1050 }
 0x21f   : > { %v1052_v1 = vsel %vm313_vm2, %v1049_v61, %v1051_v63  ;;  %1829 = vmatprep.subr.msk.bf16.mxu0 %vm319_vm0, %v1051_v63 }
 0x220   : > { %v1057_v2 = vsel %vm319_vm0, %v1052_v1, 0 }
 0x221   : > { %1063 = vmatpush1.bf16.msra.mxu0 %v1057_v2 }
 0x222   : > { %v1277_v4 = vpop.permute.xlu0 %1276  ;;  %v1127_v5 = vpop.permute.xlu1 %1126 }
 0x223   : > { %v1128_v6 = vsel %vm433_vm3, %v1125_v60, %v1127_v5  ;;  %1833 = vmatprep.subr.msk.bf16.mxu1 %vm319_vm0, %v1127_v5 }
 0x224   : > { %v1133_v7 = vsel %vm319_vm0, %v1128_v6, 0  ;;  %1830 = vmatmul.mubr.msk.bf16.vlgmr.msra.gmra.mrb[20].mxu0 %vm315_vm1, %v1827_v3 }
 0x225   : > { %1139 = vmatpush1.bf16.msra.mxu1 %v1133_v7  ;;  %1246 = vmatprep.mubr.bf16.mxu0 %v2046_v0 }
 0x226   : > { %v1203_v9 = vpop.permute.xlu1 %1202  ;;  %v1353_v11 = vpop.permute.xlu0 %1352 }
 0x227   : > { %v1204_v10 = vsel %vm503_vm4, %v1201_v62, %v1203_v9  ;;  %1837 = vmatprep.subr.msk.bf16.mxu0 %vm319_vm0, %v1203_v9 }
 0x228   : > { %v1209_v12 = vsel %vm319_vm0, %v1204_v10, 0  ;;  %1834 = vmatmul.mubr.msk.bf16.vlgmr.msra.gmra.mrb[20].mxu1 %vm315_vm1, %v1831_v8 }
 0x229   : > { %1215 = vmatpush1.bf16.msra.mxu0 %v1209_v12  ;;  %1322 = vmatprep.mubr.bf16.mxu1 %v2046_v0 }
 0x22a   : > { %v1279_v14 = vpop.permute.xlu1 %1278  ;;  %v1429_v18 = vpop.permute.xlu0 %1428 }
 0x22b   : > { %v1280_v15 = vsel %vm573_vm5, %v1277_v4, %v1279_v14  ;;  %1841 = vmatprep.subr.msk.bf16.mxu1 %vm319_vm0, %v1279_v14 }
 0x22c   : > { %v1285_v16 = vsel %vm319_vm0, %v1280_v15, 0  ;;  %1838 = vmatmul.mubr.msk.bf16.vlgmr.msra.gmra.mrb[24].mxu0 %vm315_vm1, %v1835_v13 }
 0x22d   : > { %1291 = vmatpush1.bf16.msra.mxu1 %v1285_v16  ;;  %1398 = vmatprep.mubr.bf16.mxu0 %v2046_v0 }
 0x22e   : > { %v1355_v19 = vpop.permute.xlu1 %1354  ;;  %v1505_v25 = vpop.permute.xlu0 %1504 }
 0x22f   : > { %v1356_v20 = vsel %vm643_vm6, %v1353_v11, %v1355_v19  ;;  %1845 = vmatprep.subr.msk.bf16.mxu0 %vm319_vm0, %v1355_v19 }
 0x230   : > { %v1361_v21 = vsel %vm319_vm0, %v1356_v20, 0  ;;  %1842 = vmatmul.mubr.msk.bf16.vlgmr.msra.gmra.mrb[24].mxu1 %vm315_vm1, %v1839_v17  ;;  %v2057_v20 = vmov 839922192  }
 0x231   : > { %1367 = vmatpush1.bf16.msra.mxu0 %v1361_v21  ;;  %1474 = vmatprep.mubr.bf16.mxu1 %v2046_v0  ;;  %v957_v21 = vunpack.c.l.s4 %v2057_v20 }
 0x232   : > { %v1431_v23 = vpop.permute.xlu1 %1430  ;;  %v1581_v33 = vpop.permute.xlu0 %1580 }
 0x233   : > { %v1432_v24 = vsel %vm713_vm7, %v1429_v18, %v1431_v23  ;;  %1849 = vmatprep.subr.msk.bf16.mxu1 %vm319_vm0, %v1431_v23 }
 0x234   : > { %v1437_v26 = vsel %vm319_vm0, %v1432_v24, 0  ;;  %1846 = vmatmul.mubr.msk.bf16.vlgmr.msra.gmra.mrb[28].mxu0 %vm315_vm1, %v1843_v22  ;;  %v958_v22 = vunpack.c.0.s8 %v957_v21 }
 0x235   : > { %1443 = vmatpush1.bf16.msra.mxu1 %v1437_v26  ;;  %1550 = vmatprep.mubr.bf16.mxu0 %v2046_v0  ;;  %v949_v26 = vld [vmem:[%s2180_s12] sm:$0xf]  ;;  %s279_s12 = sand.u32 1, %s2020_s22  }
 0x236   : > { %v1507_v28 = vpop.permute.xlu1 %1506  ;;  %v961_v24 = vsub.s32 %v958_v22, %v2273_v29  ;;  %s1784_s17 = sshll.u32 %s279_s12, 2  ;;  %s1669_s24 = scalar_lea.sflag [#allocation4], %s279_s12 }
 0x237   : > { %v1508_v30 = vsel %vm783_vm8, %v1505_v25, %v1507_v28  ;;  %1853 = vmatprep.subr.msk.bf16.mxu0 %vm319_vm0, %v1507_v28  ;;  %s281_s29 = scalar_lea.vmem [#allocation3], %s1784_s17 }
 0x238   : > { %v1513_v31 = vsel %vm319_vm0, %v1508_v30, 0  ;;  %1850 = vmatmul.mubr.msk.bf16.vlgmr.msra.gmra.mrb[28].mxu1 %vm315_vm1, %v1847_v27  ;;  %v950_v30 = vunpack.c.l.bf16 %v949_v26  ;;  %s1685_s18 = sshll.u32 %s281_s29, 4  ;;  %s2407_s18 = int_to_ptr.vmem [resolvable:$true] %s1685_s18 }
 0x239   : > { %1519 = vmatpush1.bf16.msra.mxu0 %v1513_v31  ;;  %1626 = vmatprep.mubr.bf16.mxu1 %v2046_v0  ;;  %s1950_s25 = scalar_lea.vmem %s2407_s18, 64 }
 0x23a   : > { %v1583_v34 = vpop.permute.xlu1 %1582  ;;  %p1951_p0 = scmp.ne.s32.totalorder %s2407_s18, %s1950_s25 }
 0x23b   : > { %v1584_v35 = vsel %vm853_vm9, %v1581_v33, %v1583_v34  ;;  %1857 = vmatprep.subr.msk.bf16.mxu1 %vm319_vm0, %v1583_v34 }
 0x23c   : > { %v1589_v36 = vsel %vm319_vm0, %v1584_v35, 0  ;;  %1854 = vmatmul.mubr.msk.bf16.vlgmr.msra.gmra.mrb[32].mxu0 %vm315_vm1, %v1851_v32  ;;  %p1952_p1 = pnand %p1951_p0, %p2145_p3 }
 0x23d   : > { %1595 = vmatpush1.bf16.msra.mxu1 %v1589_v36 }
 0x23e   : > { %p1953_p2 = pneg %p1952_p1 }
 0x240   : > { %1858 = vmatmul.mubr.msk.bf16.vlgmr.msra.gmra.mrb[32].mxu1 %vm315_vm1, %v1855_v37 }
 0x243   : > { %v955_v23 = vpop.permute.xlu0 %954 }
 0x244   : > { %v962_v31 = vrot.slane %v955_v23, %v961_v24 }
 0x246   : > { %v964_v37 = vadd.f32 %v962_v31, %v950_v30 }
 0x281   : > { %v1019_v38 = vpop.f32.mrb[16].mxu1 }
 0x282   : > { %v1021_v39 = vpop.f32.mrb[17].mxu1 }
 0x283   : > { %v1028_v0 = vcombine.low %v1019_v38, %v1021_v39  ;;  %v1023_v40 = vpop.f32.mrb[18].mxu1 }
 0x284   : > { %v1024_v41 = vpop.f32.mrb[19].mxu1 }
 0x285   : > { %1029 = vrot.lane.b32.xlu1 %v1028_v0, %s2056_s16 }
 0x2f7   : > { %v1096_v42 = vpop.f32.mrb[20].mxu0  ;;  %v1030_v25 = vpop.permute.xlu1 %1029 }
 0x2f8   : > { %v1098_v43 = vpop.f32.mrb[21].mxu0  ;;  %v1031_v28 = vrot.slane %v1030_v25, 4 }
 0x2f9   : > { %v1105_v44 = vcombine.low %v1096_v42, %v1098_v43  ;;  %v1100_v45 = vpop.f32.mrb[22].mxu0 }
 0x2fa   : > { %v1101_v46 = vpop.f32.mrb[23].mxu0  ;;  %v1033_v35 = vsel %vm1032_vm13, %v1031_v28, %v1030_v25 }
 0x2fb   : > { %1106 = vrot.lane.b32.xlu0 %v1105_v44, %s2056_s16  ;;  %v1172_v47 = vpop.f32.mrb[20].mxu1  ;;  %v1035_v40 = vadd.f32 %v1033_v35, %v964_v37 }
 0x2fc   : > { %v1174_v48 = vpop.f32.mrb[21].mxu1 }
 0x2fd   : > { %v1181_v49 = vcombine.low %v1172_v47, %v1174_v48  ;;  %v1176_v50 = vpop.f32.mrb[22].mxu1 }
 0x2fe   : > { %v1177_v52 = vpop.f32.mrb[23].mxu1 }
 0x2ff   : > { %v1248_v53 = vpop.f32.mrb[24].mxu0  ;;  %1182 = vrot.lane.b32.xlu1 %v1181_v49, %s2056_s16 }
 0x300   : > { %v1250_v54 = vpop.f32.mrb[25].mxu0 }
 0x301   : > { %v1257_v55 = vcombine.low %v1248_v53, %v1250_v54  ;;  %v1252_v56 = vpop.f32.mrb[26].mxu0 }
 0x302   : > { %v1253_v57 = vpop.f32.mrb[27].mxu0 }
 0x303   : > { %1258 = vrot.lane.b32.xlu0 %v1257_v55, %s2056_s16  ;;  %v1324_v58 = vpop.f32.mrb[24].mxu1 }
 0x304   : > { %v1326_v59 = vpop.f32.mrb[25].mxu1 }
 0x305   : > { %v1333_v60 = vcombine.low %v1324_v58, %v1326_v59  ;;  %v1328_v61 = vpop.f32.mrb[26].mxu1 }
 0x306   : > { %v1329_v62 = vpop.f32.mrb[27].mxu1 }
 0x307   : > { %v1400_v63 = vpop.f32.mrb[28].mxu0  ;;  %1334 = vrot.lane.b32.xlu1 %v1333_v60, %s2056_s16 }
 0x308   : > { %v1402_v1 = vpop.f32.mrb[29].mxu0 }
 0x309   : > { %v1409_v2 = vcombine.low %v1400_v63, %v1402_v1  ;;  %v1404_v3 = vpop.f32.mrb[30].mxu0 }
 0x30a   : > { %v1405_v4 = vpop.f32.mrb[31].mxu0 }
 0x30b   : > { %1410 = vrot.lane.b32.xlu0 %v1409_v2, %s2056_s16  ;;  %v1476_v5 = vpop.f32.mrb[28].mxu1 }
 0x30c   : > { %v1478_v6 = vpop.f32.mrb[29].mxu1 }
 0x30d   : > { %v1485_v7 = vcombine.low %v1476_v5, %v1478_v6  ;;  %v1480_v8 = vpop.f32.mrb[30].mxu1 }
 0x30e   : > { %v1481_v9 = vpop.f32.mrb[31].mxu1 }
 0x30f   : > { %v1552_v10 = vpop.f32.mrb[32].mxu0  ;;  %1486 = vrot.lane.b32.xlu1 %v1485_v7, %s2056_s16 }
 0x310   : > { %v1554_v11 = vpop.f32.mrb[33].mxu0 }
 0x311   : > { %v1561_v12 = vcombine.low %v1552_v10, %v1554_v11  ;;  %v1556_v13 = vpop.f32.mrb[34].mxu0 }
 0x312   : > { %v1557_v14 = vpop.f32.mrb[35].mxu0 }
 0x313   : > { %1562 = vrot.lane.b32.xlu0 %v1561_v12, %s2056_s16  ;;  %v1628_v15 = vpop.f32.mrb[32].mxu1 }
 0x314   : > { %v1630_v16 = vpop.f32.mrb[33].mxu1 }
 0x315   : > { %v1637_v17 = vcombine.low %v1628_v15, %v1630_v16  ;;  %v1632_v18 = vpop.f32.mrb[34].mxu1 }
 0x316   : > { %v1633_v19 = vpop.f32.mrb[35].mxu1 }
 0x317   : > { %1638 = vrot.lane.b32.xlu1 %v1637_v17, %s2056_s16 }
 0x36d   : > { %v1107_v27 = vpop.permute.xlu0 %1106 }
 0x36e   : > { %v1108_v33 = vrot.slane %v1107_v27, 4 }
 0x370   : > { %v1109_v39 = vsel %vm1032_vm13, %v1108_v33, %v1107_v27 }
 0x371   : > { %v1183_v32 = vpop.permute.xlu1 %1182  ;;  %v1111_v43 = vadd.f32 %v1109_v39, %v1035_v40 }
 0x372   : > { %v1184_v36 = vrot.slane %v1183_v32, 4 }
 0x374   : > { %v1185_v41 = vsel %vm1032_vm13, %v1184_v36, %v1183_v32 }
 0x375   : > { %v1259_v34 = vpop.permute.xlu0 %1258  ;;  %v1187_v46 = vadd.f32 %v1185_v41, %v1111_v43 }
 0x376   : > { %v1260_v0 = vrot.slane %v1259_v34, 4 }
 0x378   : > { %v1261_v44 = vsel %vm1032_vm13, %v1260_v0, %v1259_v34 }
 0x379   : > { %v1335_v38 = vpop.permute.xlu1 %1334  ;;  %v1263_v50 = vadd.f32 %v1261_v44, %v1187_v46 }
 0x37a   : > { %v1336_v42 = vrot.slane %v1335_v38, 4 }
 0x37c   : > { %v1337_v48 = vsel %vm1032_vm13, %v1336_v42, %v1335_v38 }
 0x37d   : > { %v1411_v29 = vpop.permute.xlu0 %1410  ;;  %v1339_v53 = vadd.f32 %v1337_v48, %v1263_v50 }
 0x37e   : > { %v1412_v45 = vrot.slane %v1411_v29, 4 }
 0x380   : > { %v1413_v52 = vsel %vm1032_vm13, %v1412_v45, %v1411_v29 }
 0x381   : > { %v1487_v47 = vpop.permute.xlu1 %1486  ;;  %v1415_v57 = vadd.f32 %v1413_v52, %v1339_v53 }
 0x382   : > { %v1488_v49 = vrot.slane %v1487_v47, 4 }
 0x384   : > { %v1489_v55 = vsel %vm1032_vm13, %v1488_v49, %v1487_v47 }
 0x385   : > { %v1563_v54 = vpop.permute.xlu0 %1562  ;;  %v1491_v59 = vadd.f32 %v1489_v55, %v1415_v57 }
 0x386   : > { %v1564_v56 = vrot.slane %v1563_v54, 4 }
 0x388   : > { %v1565_v58 = vsel %vm1032_vm13, %v1564_v56, %v1563_v54 }
 0x389   : > { %v1639_v60 = vpop.permute.xlu1 %1638  ;;  %v1567_v62 = vadd.f32 %v1565_v58, %v1491_v59 }
 0x38a   : > { %v1640_v61 = vrot.slane %v1639_v60, 4 }
 0x38c   : > { %v1641_v63 = vsel %vm1032_vm13, %v1640_v61, %v1639_v60 }
 0x38d   : > { %v1643_v1 = vadd.f32 %v1641_v63, %v1567_v62 }
 0x38f   : > { %v1644_v2 = vmax.f32 %v1643_v1, 0.0 }
 0x391   : > { %v1646_v3 = vcombine.high %v1644_v2, %v1644_v2 }
 0x393   : > { %v1859_v4 = vpack.c.bf16 %v1646_v3, %v1644_v2 }
 0x395   : > { %v1659_v5 = vrot.slane %v1859_v4, %v2283_v51 }
 0x397   : > { %1660 = vrot.lane.b32.xlu0 %v1659_v5, %s2481_s13  ;;  %s2058_s13 = smov [#allocation3]  }
 0x398   : > { %s1954_s17 = sshll.u32 %s2058_s13, 4  ;;  %s1955_s17 = int_to_ptr.vmem [resolvable:$false] %s1954_s17 }
 0x399   : > { %s1956_s14 = scalar_lea.vmem %s1955_s17, 128  ;;  %p1957_p4 = scmp.lt.s32.totalorder %s2407_s18, %s1955_s17 }
 0x39a   : > { %p1958_p5 = scmp.lt.s32.totalorder %s1956_s14, %s1950_s25 }
 0x39c   : > { %p1959_p6 = por %p1958_p5, %p1957_p4 }
 0x39e   : > { %p1960_p7 = pnand %p1959_p6, %p1953_p2 }
 0x409   : > { %v1661_v6 = vpop.permute.xlu0 %1660 }
 0x40a   : > { %v1662_v7 = vrot.slane %v1661_v6, 2 }
 0x40c   : > { %v1663_v51 = vsel %vm853_vm9, %v1661_v6, %v1662_v7 }
 0x40d   : > { %1667 = vst.msk [vmem:[%s281_s29] sm:$0xf] %vm1666_vm15, %v1663_v51 }
 0x40e   : > { %1963 = shalt.err (!%p1960_p7)
}
 0x40f   : > { %s1964_s12 = scalar_lea.hbm %s2405_s0, 64  ;;  %s1968_s19 = scalar_lea.hbm %s2465_s6, 256 }
 0x410   : > { %p1965_p9 = scmp.ne.s32.totalorder %s2405_s0, %s1964_s12  ;;  %p1969_p12 = scmp.lt.u32.totalorder %s2405_s0, %s2465_s6 }
 0x411   : > { %p1970_p13 = scmp.lt.u32.totalorder %s1968_s19, %s1964_s12  ;;  %p1972_p1 = scmp.lt.u32.totalorder %s1964_s12, %s2405_s0 }
 0x412   : > { %p1966_p10 = pnand %p1965_p9, %p2145_p3 }
 0x413   : > { %p1971_p0 = por %p1970_p13, %p1969_p12 }
 0x414   : > { %p1967_p11 = pneg %p1966_p10 }
 0x415   : > { %p1973_p2 = por %p1972_p1, %p1971_p0 }
 0x417   : > { %p1974_p4 = pnand %p1973_p2, %p1967_p11 }
 0x419   : > { %1977 = shalt.err (!%p1974_p4)
}
 0x41a   : > { %1866 = dma.vmem_to_hbm [thread:$0]  (%p2145_p3), %s2407_s18, 64, %s2405_s0, %s1669_s24  }
 0x41b PF: > { %p1872_p5 = scmp.ge.s32.totalorder %s2044_s28, 2  ;;  %s1697_s16 = sand.u32 1, %s2016_s21  }
 0x41c   : > { %s1698_s25 = scalar_lea.sflag [#allocation4], %s1697_s16 }
 0x41d   : > { %p1869_p6 = pnand %p1872_p5, %p2154_p8 }
 0x41f   : > { %2011 = dma.done.wait (!%p1869_p6), %s1698_s25, 64  }
 0x420   : > { %2013 = vsyncadd (!%p1869_p6), %s1698_s25, 4294967232  ;;  %s19_s28 = sadd.s32 1, %s2044_s28   ;;  %s2482_s21 = smov %s2020_s22 }
 0x421   : > { %p16_p7 = scmp.ge.s32.totalorder %s19_s28, 6   ;;  %s2483_s22 = smov %s2024_s23 }
 0x422   : > { %s2484_s23 = smov %s2163_s15  ;;  %s2485_s24 = smov %s2036_s26 }
 0x423   : > { %s2486_s25 = smov %s2040_s27  ;;  %s2487_s26 = smov %s2490_s7 }
 0x424   : > { %s2488_s27 = smov %s2494_s8  ;;  %18 = sbr.rel (!%p16_p7) target bundleno = 7 (0x7), region = 98 }
 0x42b   :  { %1703 = vsyncpa [#allocation4], 1 }
 0x42c   :  { %1705 = vsyncpa [#allocation4 + $0x1], 1 }

</bundles_post_ra>
